<compile_context>
chip_gen: v7x
topology: tpu7x:2x2x1
jax: 0.10.0
libtpu: 0.0.40
codegen_flags: <defaults>
</compile_context>

<pallas_src>
import functools

import jax
import jax.numpy as jnp
from jax.experimental import pallas as pl
from jax.experimental.pallas import tpu as pltpu


# ~2 MiB per f32 input block: measured sweet spot for mem-bound kernels
# (512-1024-row tiles reach ~85% of HBM roofline); comfortably inside VMEM on
# v5e/v6e (128 MiB) and v7x (64 MiB) with double-buffering.
_TARGET_BLOCK_BYTES = 2 * 1024 * 1024


# ----------------------------- Pallas kernel --------------------------------
def _recon_loss_kernel(rim_ref, rs_ref, tgt_ref, out_ref,
                       s_pp, s_pt, s_tt, m_p, m_t, *, inv_count):
    step = pl.program_id(0)

    @pl.when(step == 0)
    def _init():
        s_pp[...] = jnp.zeros((1, 1), jnp.float32)
        s_pt[...] = jnp.zeros((1, 1), jnp.float32)
        s_tt[...] = jnp.zeros((1, 1), jnp.float32)
        m_p[...] = jnp.full((1, 1), -jnp.inf, jnp.float32)
        m_t[...] = jnp.full((1, 1), -jnp.inf, jnp.float32)

    rs = rs_ref[...].astype(jnp.float32)      # (tile_rows, cols)
    tg = tgt_ref[...].astype(jnp.float32)

    # Element (r, c) participates iff c > rim[r]:
    #   triangle mode : rim[r] = row index inside its (N, N) matrix -> strict upper tri
    #   dense mode    : rim[r] = -1                                  -> whole row
    #   padding rows  : rim[r] >= cols                               -> row dropped
    col = jax.lax.broadcasted_iota(jnp.int32, rs.shape, 1)
    mask = col > rim_ref[...]                 # (tile_rows, 1) broadcast over lanes

    # numerically stable softplus, matches torch.nn.functional.softplus (beta=1)
    sp = jnp.maximum(rs, 0.0) + jnp.log1p(jnp.exp(-jnp.abs(rs)))

    spz = jnp.where(mask, sp, 0.0)
    tgz = jnp.where(mask, tg, 0.0)

    s_pp[...] += jnp.sum(spz * spz)
    s_pt[...] += jnp.sum(spz * tgz)
    s_tt[...] += jnp.sum(tgz * tgz)
    m_p[...] = jnp.maximum(m_p[...], jnp.max(jnp.where(mask, sp, -jnp.inf)))
    m_t[...] = jnp.maximum(m_t[...], jnp.max(jnp.where(mask, tg, -jnp.inf)))

    @pl.when(step == pl.num_programs(0) - 1)
    def _finalize():
        # minmax_norm(x, dmin=0)[0] == x / x.max(); MSE(mean) expanded so a single
        # pass over the data suffices. (1/max is NaN/Inf when max == 0, matching
        # the PyTorch semantics.)
        inv_p = 1.0 / m_p[...]
        inv_t = 1.0 / m_t[...]
        out_ref[...] = (s_pp[...] * inv_p * inv_p
                        - 2.0 * s_pt[...] * (inv_p * inv_t)
                        + s_tt[...] * inv_t * inv_t) * inv_count


def _recon_loss_pallas(rs2, tgt2, rim, *, count, tile_rows):
    if not jnp.issubdtype(rs2.dtype, jnp.floating):
        rs2 = rs2.astype(jnp.float32)
    if not jnp.issubdtype(tgt2.dtype, jnp.floating):
        tgt2 = tgt2.astype(jnp.float32)
    rows, cols = rs2.shape
    assert tgt2.shape == (rows, cols)
    nsteps = rim.shape[0] // tile_rows

    kernel = functools.partial(_recon_loss_kernel, inv_count=1.0 / float(count))
    out = pl.pallas_call(
        kernel,
        out_shape=jax.ShapeDtypeStruct((1, 1), jnp.float32),
        grid=(nsteps,),
        in_specs=[
            pl.BlockSpec((tile_rows, 1), lambda i: (i, 0)),      # per-row triangle ids
            pl.BlockSpec((tile_rows, cols), lambda i: (i, 0)),   # rs
            pl.BlockSpec((tile_rows, cols), lambda i: (i, 0)),   # target
        ],
        out_specs=pl.BlockSpec((1, 1), lambda i: (0, 0)),
        scratch_shapes=[pltpu.VMEM((1, 1), jnp.float32) for _ in range(5)],
        compiler_params=pltpu.CompilerParams(
            # The whole grid is a single carried reduction -> "arbitrary".
            dimension_semantics=("arbitrary",),
            vmem_limit_bytes=32 * 1024 * 1024,
        ),
    )(rim, rs2, tgt2)
    return out[0, 0]


# ------------------------------- JAX glue ------------------------------------
def _pick_tile_rows(rows, cols, tile_rows=None):
    """Rows per block: ~_TARGET_BLOCK_BYTES of f32, multiple of 8 (layout rule)
    unless the whole row dimension fits in a single block."""
    if tile_rows is None:
        tile_rows = max(1, _TARGET_BLOCK_BYTES // max(1, cols * 4))
    if tile_rows >= rows:
        return rows                      # full dim is always a legal block extent
    return max(8, (tile_rows // 8) * 8)  # second-to-minor block dim: multiple of 8


def _triangle_row_ids(b, n, padded_rows):
    """(b*n, n) view of b stacked (n, n) matrices: row index of each row inside its
    matrix; rows in the grid-padding region get n, which drops every lane."""
    r = jnp.arange(padded_rows, dtype=jnp.int32)
    return jnp.where(r < b * n, r % n, n).reshape(padded_rows, 1)


def _dense_row_ids(rows, cols, padded_rows):
    """All columns of every real row participate; padding rows are dropped."""
    r = jnp.arange(padded_rows, dtype=jnp.int32)
    return jnp.where(r < rows, -1, cols).reshape(padded_rows, 1)


def vectorize_distance_from_DM(dm):
    """Strict upper triangle of (..., N, N) -> (..., N*(N-1)//2).
    XLA fallback / reference only; the main path masks the triangle in-kernel."""
    n = dm.shape[-1]
    iu, ju = jnp.triu_indices(n, k=1)
    return dm[..., iu, ju]


@functools.partial(jax.jit, static_argnames=("tile_rows",))
def recon_loss(rs, target, tile_rows=None):
    """ReconLoss.forward with lossFun = nn.MSELoss(reduction='mean')."""
    if target.ndim >= 2 and target.shape[-1] == target.shape[-2]:
        n = target.shape[-1]
        m = n * (n - 1) // 2
        vec_shape = target.shape[:-2] + (m,)
        if rs.shape != vec_shape:
            # Both operands are (..., N, N) matrices (rs possibly flattened to
            # (..., N*N)): feed them directly, triangle is masked in-kernel.
            rs2 = rs.reshape(-1, n)        # (B*N, N), free row-major reshape
            tgt2 = target.reshape(-1, n)
            b = tgt2.shape[0] // n
            tr = _pick_tile_rows(tgt2.shape[0], n, tile_rows)
            r_pad = pl.cdiv(tgt2.shape[0], tr) * tr
            rim = _triangle_row_ids(b, n, r_pad)
            return _recon_loss_pallas(rs2, tgt2, rim, count=b * m, tile_rows=tr)
        # rs already arrives vectorized while target is a matrix (rare path):
        # gather target's triangle in XLA, then run the dense kernel.
        tgt2 = vectorize_distance_from_DM(target).reshape(-1, m)
        rs2 = rs.reshape(-1, m)
    else:
        # target already vectorized
        tgt2 = target.reshape(-1, target.shape[-1])
        if rs.shape != target.shape:
            if rs.shape[-1] != rs.shape[-2]:
                nn_ = int(round(rs.shape[-1] ** 0.5))
                rs = rs.reshape(-1, nn_, nn_)
            rs2 = vectorize_distance_from_DM(rs).reshape(tgt2.shape)
        else:
            rs2 = rs.reshape(tgt2.shape)

    rows, cols = tgt2.shape
    tr = _pick_tile_rows(rows, cols, tile_rows)
    r_pad = pl.cdiv(rows, tr) * tr
    rim = _dense_row_ids(rows, cols, r_pad)
    return _recon_loss_pallas(rs2, tgt2, rim, count=rows * cols, tile_rows=tr)


# --------------------------- pure-JAX reference -------------------------------
def recon_loss_ref(rs, target):
    if target.shape[-1] == target.shape[-2]:
        target = vectorize_distance_from_DM(target)
    if rs.shape != target.shape:
        if rs.shape[-1] != rs.shape[-2]:
            n = int(round(rs.shape[-1] ** 0.5))
            rs = rs.reshape(-1, n, n)
        rs = vectorize_distance_from_DM(rs)
    rs = jax.nn.softplus(rs.astype(jnp.float32))
    rs = rs / jnp.max(rs)
    target = target.astype(jnp.float32)
    target = target / jnp.max(target)
    return jnp.mean((rs - target) ** 2)


# ---------------------------------- main --------------------------------------
if __name__ == "__main__":
    key = jax.random.PRNGKey(0)
    k1, k2 = jax.random.split(key)

    B, N = 2, 16
    rs = jax.random.normal(k1, (B, N, N), dtype=jnp.float32)                  # raw model output
    t = jax.random.uniform(k2, (B, N, N), dtype=jnp.float32, minval=0.0, maxval=2.0)
    target = 0.5 * (t + jnp.swapaxes(t, -1, -2))                              # symmetric distances

    ref = recon_loss_ref(rs, target)

    # 1) main path: (B, N, N) inputs, auto-chosen tiles
    loss = jax.block_until_ready(recon_loss(rs, target))
    assert jnp.allclose(loss, ref, rtol=1e-4, atol=1e-6), (loss, ref)

    # 2) forced small tiles -> multi-step grid, exercises the carried accumulators
    loss_tiled = jax.block_until_ready(recon_loss(rs, target, tile_rows=8))
    assert jnp.allclose(loss_tiled, ref, rtol=1e-4, atol=1e-6), (loss_tiled, ref)

    # 3) rs given in flattened (B, N*N) form (ReconLoss's .view(-1, N, N) branch)
    loss_flat = jax.block_until_ready(recon_loss(rs.reshape(B, N * N), target))
    assert jnp.allclose(loss_flat, ref, rtol=1e-4, atol=1e-6), (loss_flat, ref)

    # 4) both inputs already vectorized -> dense (no-triangle) kernel path
    loss_vec = jax.block_until_ready(
        recon_loss(vectorize_distance_from_DM(rs), vectorize_distance_from_DM(target)))
    assert jnp.allclose(loss_vec, ref, rtol=1e-4, atol=1e-6), (loss_vec, ref)

    print("KERNEL_OK")
</pallas_src>

<mosaic_0001>
module attributes {stable_mosaic.version = 11 : i64} {
  func.func @_recon_loss_kernel(%arg0: i32, %arg1: memref<32x1xi32, #tpu.memory_space<vmem>>, %arg2: memref<32x16xf32, #tpu.memory_space<vmem>>, %arg3: memref<32x16xf32, #tpu.memory_space<vmem>>, %arg4: memref<1x1xf32, #tpu.memory_space<vmem>>, %arg5: memref<1x1xf32, #tpu.memory_space<vmem>>, %arg6: memref<1x1xf32, #tpu.memory_space<vmem>>, %arg7: memref<1x1xf32, #tpu.memory_space<vmem>>, %arg8: memref<1x1xf32, #tpu.memory_space<vmem>>, %arg9: memref<1x1xf32, #tpu.memory_space<vmem>>) attributes {dimension_semantics = [#tpu.dimension_semantics<arbitrary>], iteration_bounds = array<i64: 1>, scalar_prefetch = 0 : i64, scratch_operands = 5 : i64, tpu.core_type = #tpu.core_type<tc>, window_params = [{transform_indices = @transform_0, window_bounds = array<i64: 32, 1>}, {transform_indices = @transform_1, window_bounds = array<i64: 32, 16>}, {transform_indices = @transform_2, window_bounds = array<i64: 32, 16>}, {pipeline_mode = #tpu.pipeline_mode<synchronous>, transform_indices = @transform_3, window_bounds = array<i64: 1, 1>}]} {
    %c0_i32 = arith.constant 0 : i32
    %0 = arith.cmpi eq, %arg0, %c0_i32 : i32
    %1 = arith.extui %0 : i1 to i32
    %c0_i32_0 = arith.constant 0 : i32
    %2 = arith.cmpi ne, %1, %c0_i32_0 : i32
    scf.if %2 {
      %cst_38 = arith.constant 0.000000e+00 : f32
      %71 = vector.broadcast %cst_38 : f32 to vector<1x1xf32>
      %c0_39 = arith.constant 0 : index
      %c0_40 = arith.constant 0 : index
      %72 = vector.load %arg5[%c0_39, %c0_40] : memref<1x1xf32, #tpu.memory_space<vmem>>, vector<1x1xf32>
      tpu.vector_store %arg5[%c0_39, %c0_40], %71 {strides = array<i32>} : memref<1x1xf32, #tpu.memory_space<vmem>>, vector<1x1xf32>,
      %cst_41 = arith.constant 0.000000e+00 : f32
      %73 = vector.broadcast %cst_41 : f32 to vector<1x1xf32>
      %c0_42 = arith.constant 0 : index
      %c0_43 = arith.constant 0 : index
      %74 = vector.load %arg6[%c0_42, %c0_43] : memref<1x1xf32, #tpu.memory_space<vmem>>, vector<1x1xf32>
      tpu.vector_store %arg6[%c0_42, %c0_43], %73 {strides = array<i32>} : memref<1x1xf32, #tpu.memory_space<vmem>>, vector<1x1xf32>,
      %cst_44 = arith.constant 0.000000e+00 : f32
      %75 = vector.broadcast %cst_44 : f32 to vector<1x1xf32>
      %c0_45 = arith.constant 0 : index
      %c0_46 = arith.constant 0 : index
      %76 = vector.load %arg7[%c0_45, %c0_46] : memref<1x1xf32, #tpu.memory_space<vmem>>, vector<1x1xf32>
      tpu.vector_store %arg7[%c0_45, %c0_46], %75 {strides = array<i32>} : memref<1x1xf32, #tpu.memory_space<vmem>>, vector<1x1xf32>,
      %cst_47 = arith.constant 0xFF800000 : f32
      %77 = vector.broadcast %cst_47 : f32 to vector<1x1xf32>
      %c0_48 = arith.constant 0 : index
      %c0_49 = arith.constant 0 : index
      %78 = vector.load %arg8[%c0_48, %c0_49] : memref<1x1xf32, #tpu.memory_space<vmem>>, vector<1x1xf32>
      tpu.vector_store %arg8[%c0_48, %c0_49], %77 {strides = array<i32>} : memref<1x1xf32, #tpu.memory_space<vmem>>, vector<1x1xf32>,
      %cst_50 = arith.constant 0xFF800000 : f32
      %79 = vector.broadcast %cst_50 : f32 to vector<1x1xf32>
      %c0_51 = arith.constant 0 : index
      %c0_52 = arith.constant 0 : index
      %80 = vector.load %arg9[%c0_51, %c0_52] : memref<1x1xf32, #tpu.memory_space<vmem>>, vector<1x1xf32>
      tpu.vector_store %arg9[%c0_51, %c0_52], %79 {strides = array<i32>} : memref<1x1xf32, #tpu.memory_space<vmem>>, vector<1x1xf32>,
    } else {
    }
    %c0 = arith.constant 0 : index
    %c0_1 = arith.constant 0 : index
    %3 = vector.load %arg2[%c0, %c0_1] : memref<32x16xf32, #tpu.memory_space<vmem>>, vector<32x16xf32>
    %c0_2 = arith.constant 0 : index
    %c0_3 = arith.constant 0 : index
    %4 = vector.load %arg3[%c0_2, %c0_3] : memref<32x16xf32, #tpu.memory_space<vmem>>, vector<32x16xf32>
    %5 = tpu.iota {dimensions = array<i32: 1>} : vector<32x16xi32>
    %c0_4 = arith.constant 0 : index
    %c0_5 = arith.constant 0 : index
    %6 = vector.load %arg1[%c0_4, %c0_5] : memref<32x1xi32, #tpu.memory_space<vmem>>, vector<32x1xi32>
    %7 = vector.broadcast %6 : vector<32x1xi32> to vector<32x16xi32>
    %8 = arith.cmpi sgt, %5, %7 : vector<32x16xi32>
    %cst = arith.constant 0.000000e+00 : f32
    %9 = vector.broadcast %cst : f32 to vector<32x16xf32>
    %10 = arith.maximumf %3, %9 : vector<32x16xf32>
    %11 = math.absf %3 : vector<32x16xf32>
    %cst_6 = arith.constant 0.000000e+00 : f32
    %12 = vector.broadcast %cst_6 : f32 to vector<32x16xf32>
    %13 = arith.subf %12, %11 : vector<32x16xf32>
    %14 = math.exp %13 : vector<32x16xf32>
    %15 = math.log1p %14 : vector<32x16xf32>
    %16 = arith.addf %10, %15 : vector<32x16xf32>
    %cst_7 = arith.constant 0.000000e+00 : f32
    %17 = vector.broadcast %cst_7 : f32 to vector<32x16xf32>
    %18 = arith.select %8, %16, %17 : vector<32x16xi1>, vector<32x16xf32>
    %cst_8 = arith.constant 0.000000e+00 : f32
    %19 = vector.broadcast %cst_8 : f32 to vector<32x16xf32>
    %20 = arith.select %8, %4, %19 : vector<32x16xi1>, vector<32x16xf32>
    %c0_9 = arith.constant 0 : index
    %c0_10 = arith.constant 0 : index
    %21 = vector.load %arg5[%c0_9, %c0_10] : memref<1x1xf32, #tpu.memory_space<vmem>>, vector<1x1xf32>
    %22 = arith.mulf %18, %18 : vector<32x16xf32>
    %23 = vector.shape_cast %22 : vector<32x16xf32> to vector<1x32x16xf32>
    %cst_11 = arith.constant dense<0.000000e+00> : vector<1xf32>
    %24 = vector.multi_reduction <add>, %23, %cst_11 [1, 2] : vector<1x32x16xf32> to vector<1xf32>
    %25 = vector.shape_cast %24 : vector<1xf32> to vector<1x1x1xf32>
    %26 = vector.extract %25[0, 0, 0] : f32 from vector<1x1x1xf32>
    %27 = vector.broadcast %26 : f32 to vector<1x1xf32>
    %28 = arith.addf %21, %27 : vector<1x1xf32>
    %c0_12 = arith.constant 0 : index
    %c0_13 = arith.constant 0 : index
    %29 = vector.load %arg5[%c0_12, %c0_13] : memref<1x1xf32, #tpu.memory_space<vmem>>, vector<1x1xf32>
    tpu.vector_store %arg5[%c0_12, %c0_13], %28 {strides = array<i32>} : memref<1x1xf32, #tpu.memory_space<vmem>>, vector<1x1xf32>,
    %c0_14 = arith.constant 0 : index
    %c0_15 = arith.constant 0 : index
    %30 = vector.load %arg6[%c0_14, %c0_15] : memref<1x1xf32, #tpu.memory_space<vmem>>, vector<1x1xf32>
    %31 = arith.mulf %18, %20 : vector<32x16xf32>
    %32 = vector.shape_cast %31 : vector<32x16xf32> to vector<1x32x16xf32>
    %cst_16 = arith.constant dense<0.000000e+00> : vector<1xf32>
    %33 = vector.multi_reduction <add>, %32, %cst_16 [1, 2] : vector<1x32x16xf32> to vector<1xf32>
    %34 = vector.shape_cast %33 : vector<1xf32> to vector<1x1x1xf32>
    %35 = vector.extract %34[0, 0, 0] : f32 from vector<1x1x1xf32>
    %36 = vector.broadcast %35 : f32 to vector<1x1xf32>
    %37 = arith.addf %30, %36 : vector<1x1xf32>
    %c0_17 = arith.constant 0 : index
    %c0_18 = arith.constant 0 : index
    %38 = vector.load %arg6[%c0_17, %c0_18] : memref<1x1xf32, #tpu.memory_space<vmem>>, vector<1x1xf32>
    tpu.vector_store %arg6[%c0_17, %c0_18], %37 {strides = array<i32>} : memref<1x1xf32, #tpu.memory_space<vmem>>, vector<1x1xf32>,
    %c0_19 = arith.constant 0 : index
    %c0_20 = arith.constant 0 : index
    %39 = vector.load %arg7[%c0_19, %c0_20] : memref<1x1xf32, #tpu.memory_space<vmem>>, vector<1x1xf32>
    %40 = arith.mulf %20, %20 : vector<32x16xf32>
    %41 = vector.shape_cast %40 : vector<32x16xf32> to vector<1x32x16xf32>
    %cst_21 = arith.constant dense<0.000000e+00> : vector<1xf32>
    %42 = vector.multi_reduction <add>, %41, %cst_21 [1, 2] : vector<1x32x16xf32> to vector<1xf32>
    %43 = vector.shape_cast %42 : vector<1xf32> to vector<1x1x1xf32>
    %44 = vector.extract %43[0, 0, 0] : f32 from vector<1x1x1xf32>
    %45 = vector.broadcast %44 : f32 to vector<1x1xf32>
    %46 = arith.addf %39, %45 : vector<1x1xf32>
    %c0_22 = arith.constant 0 : index
    %c0_23 = arith.constant 0 : index
    %47 = vector.load %arg7[%c0_22, %c0_23] : memref<1x1xf32, #tpu.memory_space<vmem>>, vector<1x1xf32>
    tpu.vector_store %arg7[%c0_22, %c0_23], %46 {strides = array<i32>} : memref<1x1xf32, #tpu.memory_space<vmem>>, vector<1x1xf32>,
    %c0_24 = arith.constant 0 : index
    %c0_25 = arith.constant 0 : index
    %48 = vector.load %arg8[%c0_24, %c0_25] : memref<1x1xf32, #tpu.memory_space<vmem>>, vector<1x1xf32>
    %cst_26 = arith.constant 0xFF800000 : f32
    %49 = vector.broadcast %cst_26 : f32 to vector<32x16xf32>
    %50 = arith.select %8, %16, %49 : vector<32x16xi1>, vector<32x16xf32>
    %51 = vector.shape_cast %50 : vector<32x16xf32> to vector<1x32x16xf32>
    %cst_27 = arith.constant dense<0xFF800000> : vector<1xf32>
    %52 = vector.multi_reduction <maximumf>, %51, %cst_27 [1, 2] : vector<1x32x16xf32> to vector<1xf32>
    %53 = vector.shape_cast %52 : vector<1xf32> to vector<1x1x1xf32>
    %54 = vector.extract %53[0, 0, 0] : f32 from vector<1x1x1xf32>
    %55 = vector.broadcast %54 : f32 to vector<1x1xf32>
    %56 = arith.maximumf %48, %55 : vector<1x1xf32>
    %c0_28 = arith.constant 0 : index
    %c0_29 = arith.constant 0 : index
    %57 = vector.load %arg8[%c0_28, %c0_29] : memref<1x1xf32, #tpu.memory_space<vmem>>, vector<1x1xf32>
    tpu.vector_store %arg8[%c0_28, %c0_29], %56 {strides = array<i32>} : memref<1x1xf32, #tpu.memory_space<vmem>>, vector<1x1xf32>,
    %c0_30 = arith.constant 0 : index
    %c0_31 = arith.constant 0 : index
    %58 = vector.load %arg9[%c0_30, %c0_31] : memref<1x1xf32, #tpu.memory_space<vmem>>, vector<1x1xf32>
    %cst_32 = arith.constant 0xFF800000 : f32
    %59 = vector.broadcast %cst_32 : f32 to vector<32x16xf32>
    %60 = arith.select %8, %4, %59 : vector<32x16xi1>, vector<32x16xf32>
    %61 = vector.shape_cast %60 : vector<32x16xf32> to vector<1x32x16xf32>
    %cst_33 = arith.constant dense<0xFF800000> : vector<1xf32>
    %62 = vector.multi_reduction <maximumf>, %61, %cst_33 [1, 2] : vector<1x32x16xf32> to vector<1xf32>
    %63 = vector.shape_cast %62 : vector<1xf32> to vector<1x1x1xf32>
    %64 = vector.extract %63[0, 0, 0] : f32 from vector<1x1x1xf32>
    %65 = vector.broadcast %64 : f32 to vector<1x1xf32>
    %66 = arith.maximumf %58, %65 : vector<1x1xf32>
    %c0_34 = arith.constant 0 : index
    %c0_35 = arith.constant 0 : index
    %67 = vector.load %arg9[%c0_34, %c0_35] : memref<1x1xf32, #tpu.memory_space<vmem>>, vector<1x1xf32>
    tpu.vector_store %arg9[%c0_34, %c0_35], %66 {strides = array<i32>} : memref<1x1xf32, #tpu.memory_space<vmem>>, vector<1x1xf32>,
    %c0_i32_36 = arith.constant 0 : i32
    %68 = arith.cmpi eq, %arg0, %c0_i32_36 : i32
    %69 = arith.extui %68 : i1 to i32
    %c0_i32_37 = arith.constant 0 : i32
    %70 = arith.cmpi ne, %69, %c0_i32_37 : i32
    scf.if %70 {
      %c0_38 = arith.constant 0 : index
      %c0_39 = arith.constant 0 : index
      %71 = vector.load %arg8[%c0_38, %c0_39] : memref<1x1xf32, #tpu.memory_space<vmem>>, vector<1x1xf32>
      %cst_40 = arith.constant 1.000000e+00 : f32
      %72 = vector.broadcast %cst_40 : f32 to vector<1x1xf32>
      %73 = arith.divf %72, %71 : vector<1x1xf32>
      %c0_41 = arith.constant 0 : index
      %c0_42 = arith.constant 0 : index
      %74 = vector.load %arg9[%c0_41, %c0_42] : memref<1x1xf32, #tpu.memory_space<vmem>>, vector<1x1xf32>
      %cst_43 = arith.constant 1.000000e+00 : f32
      %75 = vector.broadcast %cst_43 : f32 to vector<1x1xf32>
      %76 = arith.divf %75, %74 : vector<1x1xf32>
      %c0_44 = arith.constant 0 : index
      %c0_45 = arith.constant 0 : index
      %77 = vector.load %arg5[%c0_44, %c0_45] : memref<1x1xf32, #tpu.memory_space<vmem>>, vector<1x1xf32>
      %78 = arith.mulf %77, %73 : vector<1x1xf32>
      %79 = arith.mulf %78, %73 : vector<1x1xf32>
      %c0_46 = arith.constant 0 : index
      %c0_47 = arith.constant 0 : index
      %80 = vector.load %arg6[%c0_46, %c0_47] : memref<1x1xf32, #tpu.memory_space<vmem>>, vector<1x1xf32>
      %cst_48 = arith.constant 2.000000e+00 : f32
      %81 = vector.broadcast %cst_48 : f32 to vector<1x1xf32>
      %82 = arith.mulf %81, %80 : vector<1x1xf32>
      %83 = arith.mulf %73, %76 : vector<1x1xf32>
      %84 = arith.mulf %82, %83 : vector<1x1xf32>
      %85 = arith.subf %79, %84 : vector<1x1xf32>
      %c0_49 = arith.constant 0 : index
      %c0_50 = arith.constant 0 : index
      %86 = vector.load %arg7[%c0_49, %c0_50] : memref<1x1xf32, #tpu.memory_space<vmem>>, vector<1x1xf32>
      %87 = arith.mulf %86, %76 : vector<1x1xf32>
      %88 = arith.mulf %87, %76 : vector<1x1xf32>
      %89 = arith.addf %85, %88 : vector<1x1xf32>
      %cst_51 = arith.constant 0.00416666688 : f32
      %90 = vector.broadcast %cst_51 : f32 to vector<1x1xf32>
      %91 = arith.mulf %89, %90 : vector<1x1xf32>
      %c0_52 = arith.constant 0 : index
      %c0_53 = arith.constant 0 : index
      %92 = vector.load %arg4[%c0_52, %c0_53] : memref<1x1xf32, #tpu.memory_space<vmem>>, vector<1x1xf32>
      tpu.vector_store %arg4[%c0_52, %c0_53], %91 {strides = array<i32>} : memref<1x1xf32, #tpu.memory_space<vmem>>, vector<1x1xf32>,
    } else {
    }
    return
  }
  func.func @transform_0(%arg0: i32) -> (i32, i32) {
    %c0_i32 = arith.constant 0 : i32
    %c0_i32_0 = arith.constant 0 : i32
    return %arg0, %c0_i32 : i32, i32
  }
  func.func @transform_1(%arg0: i32) -> (i32, i32) {
    %c0_i32 = arith.constant 0 : i32
    %c0_i32_0 = arith.constant 0 : i32
    return %arg0, %c0_i32 : i32, i32
  }
  func.func @transform_2(%arg0: i32) -> (i32, i32) {
    %c0_i32 = arith.constant 0 : i32
    %c0_i32_0 = arith.constant 0 : i32
    return %arg0, %c0_i32 : i32, i32
  }
  func.func @transform_3(%arg0: i32) -> (i32, i32) {
    %c0_i32 = arith.constant 0 : i32
    %c0_i32_0 = arith.constant 0 : i32
    %c0_i32_1 = arith.constant 0 : i32
    return %c0_i32, %c0_i32_0 : i32, i32
  }
}

</mosaic_0001>

<bundles_post_ra>
// kernel: recon_loss.1
= control target key start
LH: loop header
LB: loop body
LE: loop exit
PB: predicated region body
PF: predicated region fallthrough
CT: control target
= control target key end

     0   :  { %8 = vsyncpa [#allocation8], 0  ;;  %s534_s0 = inlined_call_operand.vmem [shape: s32[32,1], index: 0, kind: input, shape index: {}]   ;;  %s535_s1 = inlined_call_operand.vmem [shape: f32[32,16], index: 1, kind: input, shape index: {}]   ;;  %s536_s2 = inlined_call_operand.hbm [shape: f32[32,16], index: 2, kind: input, shape index: {}]   ;;  %s537_s3 = inlined_call_operand.hbm [shape: f32[1,1], index: 3, kind: output, shape index: {}]  }
   0x1   :  { %9 = vsyncpa [#allocation9], 0  ;;  %s384_s12 = smov [#allocation7]   ;;  %s336_s16 = scalar_lea.hbm %s536_s2, 512 }
   0x2   :  { %s19_s13 = sshll.u32 %s384_s12, 4  ;;  %p337_p0 = scmp.ne.s32.totalorder %s536_s2, %s336_s16  ;;  %s20_s13 = int_to_ptr.vmem [resolvable:$true] %s19_s13 }
   0x3   :  { %p340_p1 = scmp.lt.u32.totalorder %s336_s16, %s536_s2 }
   0x5   :  { %p342_p2 = pnand %p340_p1, %p337_p0 }
   0x7   :  { %345 = shalt.err (!%p342_p2)
}
   0x8   :  { %s346_s21 = scalar_lea.vmem %s20_s13, 512  ;;  %p351_p4 = scmp.lt.s32.totalorder %s20_s13, %s20_s13 }
   0x9   :  { %p347_p3 = scmp.ne.s32.totalorder %s20_s13, %s346_s21  ;;  %p352_p5 = scmp.lt.s32.totalorder %s346_s21, %s346_s21 }
   0xb   :  { %p353_p6 = por %p352_p5, %p351_p4 }
   0xd   :  { %p354_p7 = pnand %p353_p6, %p347_p3 }
   0xf   :  { %357 = shalt.err (!%p354_p7)
}
  0x10   :  { %s385_s22 = smov 128   ;;  %s386_s23 = smov 8  }
  0x11   :  { %25 = dma.hbm_to_vmem [thread:$0]  %s536_s2, 512, %s20_s13, [#allocation8], %s385_s22, %s385_s22, %s386_s23  }
  0x12   :  { %380 = dma.done.wait [#allocation8], 512  }
  0x13   :  { %381 = vsyncadd [#allocation8], 4294966784  ;;  %v387_v0 = vmov 0   ;;  %v51_v1 = vld [vmem:[%s534_s0 + $0x10] sm:$0xff]  ;;  %v49_v2 = vld [vmem:[%s534_s0] sm:$0xff]  ;;  %v47_v49 = vlaneseq  ;;  %vm142_vm6 = vcmask 130048  }
  0x14   :  { %315 = vset.pattern.permute.xlu1 %v387_v0  ;;  %314 = vset.pattern.permute.xlu0 %v387_v0  ;;  %v52_v3 = vld [vmem:[%s534_s0 + $0x18] sm:$0xff]  ;;  %v50_v4 = vld [vmem:[%s534_s0 + $0x8] sm:$0xff]  ;;  %v438_v5 = vld [vmem:[%s535_s1 + $0x10] sm:$0xff]  ;;  %vm33_vm9 = vcmask 0   ;;  %s390_s17 = smov [#allocation10]  }
  0x15   :  { %60 = vperm.xlu1 %315, %v51_v1   ;;  %54 = vperm.xlu0 %314, %v49_v2   ;;  %v443_v6 = vld [vmem:[%s535_s1] sm:$0xff]  ;;  %v75_v7 = vand.u32 2147483647, %v438_v5  ;;  %v450_v9 = vld [vmem:[%s535_s1 + $0x18] sm:$0xff]  ;;  %v455_v10 = vld [vmem:[%s535_s1 + $0x8] sm:$0xff]  ;;  %v71_v52 = vmax.f32 %v438_v5, 0.0 }
  0x16   :  { %v73_v8 = vand.u32 2147483647, %v443_v6  ;;  %v76_v12 = vand.u32 2147483647, %v450_v9  ;;  %v74_v14 = vand.u32 2147483647, %v455_v10 }
  0x17   :  { %v79_v11 = vsub.f32 0.0, %v75_v7  ;;  %v69_v54 = vmax.f32 %v443_v6, 0.0  ;;  %v48_v61 = vand.u32 127, %v47_v49  ;;  %v72_v0 = vmax.f32 %v450_v9, 0.0  ;;  %v45_v1 = vld [vmem:[#allocation7 + $0x10] sm:$0xff]  ;;  %s288_s18 = sshll.u32 %s390_s17, 4  ;;  %s289_s18 = int_to_ptr.vmem [resolvable:$true] %s288_s18 }
  0x18   :  { %v77_v13 = vsub.f32 0.0, %v73_v8  ;;  %v80_v16 = vsub.f32 0.0, %v76_v12  ;;  %v78_v18 = vsub.f32 0.0, %v74_v14  ;;  %v43_v8 = vld [vmem:[#allocation7] sm:$0xff]  ;;  %s358_s19 = scalar_lea.vmem %s289_s18, 16  ;;  %s362_s20 = scalar_lea.vmem %s289_s18, 32 }
  0x19   :  { %63 = vperm.xlu1 %315, %v52_v3   ;;  %57 = vperm.xlu0 %314, %v50_v4   ;;  %v85_v15 = vmul.f32 1.442695, %v79_v11  ;;  %v70_v4 = vmax.f32 %v455_v10, 0.0  ;;  %p359_p8 = scmp.ne.s32.totalorder %s289_s18, %s358_s19  ;;  %p363_p9 = scmp.lt.s32.totalorder %s289_s18, %s289_s18 }
  0x1a   :  { %v81_v17 = vmul.f32 1.442695, %v77_v13  ;;  %v87_v19 = vmul.f32 1.442695, %v80_v16  ;;  %v83_v20 = vmul.f32 1.442695, %v78_v18  ;;  %p364_p10 = scmp.lt.s32.totalorder %s362_s20, %s358_s19 }
  0x1b   :  { %316 = vpow2.f32 %v85_v15  ;;  %v46_v16 = vld [vmem:[#allocation7 + $0x18] sm:$0xff] }
  0x1c   :  { %318 = vpow2.f32 %v81_v17  ;;  %p365_p11 = por %p364_p10, %p363_p9 }
  0x1d   :  { %320 = vpow2.f32 %v87_v19 }
  0x1e   :  { %322 = vpow2.f32 %v83_v20  ;;  %p366_p12 = pnand %p365_p11, %p359_p8 }
  0x25   :  { %v317_v21 = vpop.eup %316 }
  0x26   :  { %v319_v22 = vpop.eup %318  ;;  %v107_v23 = vadd.f32 1.0, %v317_v21  ;;  %v110_v29 = vmul.f32 -0.5, %v317_v21  ;;  %v113_v32 = vand.u32 2147483647, %v317_v21 }
  0x27   :  { %v321_v24 = vpop.eup %320  ;;  %v89_v25 = vadd.f32 1.0, %v319_v22  ;;  %v92_v30 = vmul.f32 -0.5, %v319_v22  ;;  %v95_v38 = vand.u32 2147483647, %v319_v22 }
  0x28   :  { %v323_v26 = vpop.eup %322  ;;  %324 = vlog2.f32 %v107_v23  ;;  %v116_v27 = vadd.f32 1.0, %v321_v24  ;;  %v111_v31 = vadd.f32 1.0, %v110_v29  ;;  %v119_v33 = vmul.f32 -0.5, %v321_v24  ;;  %v44_v23 = vld [vmem:[#allocation7 + $0x8] sm:$0xff] }
  0x29   :  { %326 = vlog2.f32 %v89_v25  ;;  %v98_v28 = vadd.f32 1.0, %v323_v26  ;;  %v93_v35 = vadd.f32 1.0, %v92_v30  ;;  %v101_v36 = vmul.f32 -0.5, %v323_v26 }
  0x2a   :  { %328 = vlog2.f32 %v116_v27  ;;  %v112_v40 = vmul.f32 %v317_v21, %v111_v31  ;;  %vm459_vm0 = vcmp.lt.f32.partialorder %v113_v32, 0.0004427343  ;;  %v120_v42 = vadd.f32 1.0, %v119_v33 }
  0x2b   :  { %330 = vlog2.f32 %v98_v28  ;;  %v94_v45 = vmul.f32 %v319_v22, %v93_v35  ;;  %v122_v46 = vand.u32 2147483647, %v321_v24  ;;  %v102_v47 = vadd.f32 1.0, %v101_v36 }
  0x2c   :  { %vm463_vm1 = vcmp.lt.f32.partialorder %v95_v38, 0.0004427343  ;;  %v104_v51 = vand.u32 2147483647, %v323_v26  ;;  %v121_v56 = vmul.f32 %v321_v24, %v120_v42 }
  0x2d   :  { %vm473_vm2 = vcmp.lt.f32.partialorder %v122_v46, 0.0004427343  ;;  %v103_v60 = vmul.f32 %v323_v26, %v102_v47 }
  0x2e   :  { %vm477_vm3 = vcmp.lt.f32.partialorder %v104_v51, 0.0004427343 }
  0x32   :  { %v325_v34 = vpop.eup %324 }
  0x33   :  { %v327_v37 = vpop.eup %326  ;;  %v109_v39 = vmul.f32 0.6931472, %v325_v34 }
  0x34   :  { %v329_v43 = vpop.eup %328  ;;  %v91_v44 = vmul.f32 0.6931472, %v327_v37 }
  0x35   :  { %v331_v48 = vpop.eup %330  ;;  %v115_v53 = vsel %vm459_vm0, %v112_v40, %v109_v39  ;;  %v118_v55 = vmul.f32 0.6931472, %v329_v43 }
  0x36   :  { %v97_v57 = vsel %vm463_vm1, %v94_v45, %v91_v44  ;;  %v100_v59 = vmul.f32 0.6931472, %v331_v48  ;;  %v127_v63 = vadd.f32 %v115_v53, %v71_v52 }
  0x37   :  { %v125_v2 = vadd.f32 %v97_v57, %v69_v54  ;;  %v124_v3 = vsel %vm473_vm2, %v121_v56, %v118_v55 }
  0x38   :  { %v106_v7 = vsel %vm477_vm3, %v103_v60, %v100_v59  ;;  %v128_v13 = vadd.f32 %v124_v3, %v72_v0 }
  0x39   :  { %v126_v17 = vadd.f32 %v106_v7, %v70_v4 }
  0x94   :  { %v61_v5 = vpop.permute.xlu1 %60  ;;  %v55_v6 = vpop.permute.xlu0 %54 }
  0x95   :  { %vm67_vm4 = vcmp.gt.s32.totalorder %v48_v61, %v61_v5  ;;  %vm65_vm5 = vcmp.gt.s32.totalorder %v48_v61, %v55_v6 }
  0x96   :  { %v131_v11 = vsel %vm67_vm4, %v127_v63, 0.0  ;;  %v135_v12 = vsel %vm67_vm4, %v45_v1, 0.0  ;;  %v214_v9 = vsel %vm67_vm4, %v127_v63, -inf  ;;  %v238_v14 = vsel %vm67_vm4, %v45_v1, -inf }
  0x97   :  { %v129_v15 = vsel %vm65_vm5, %v125_v2, 0.0  ;;  %v140_v18 = vmul.f32 %v131_v11, %v131_v11  ;;  %v166_v10 = vmul.f32 %v135_v12, %v131_v11  ;;  %v190_v19 = vmul.f32 %v135_v12, %v135_v12 }
  0x98   :  { %v133_v20 = vsel %vm65_vm5, %v43_v8, 0.0  ;;  %v64_v21 = vpop.permute.xlu1 %63  ;;  %v58_v22 = vpop.permute.xlu0 %57  ;;  %v138_v24 = vmul.f32 %v129_v15, %v129_v15  ;;  %v212_v25 = vsel %vm65_vm5, %v125_v2, -inf  ;;  %v236_v27 = vsel %vm65_vm5, %v43_v8, -inf }
  0x99   :  { %vm68_vm7 = vcmp.gt.s32.totalorder %v48_v61, %v64_v21  ;;  %vm66_vm8 = vcmp.gt.s32.totalorder %v48_v61, %v58_v22  ;;  %v164_v26 = vmul.f32 %v133_v20, %v129_v15  ;;  %v188_v30 = vmul.f32 %v133_v20, %v133_v20 }
  0x9a   :  { %v132_v28 = vsel %vm68_vm7, %v128_v13, 0.0  ;;  %v136_v29 = vsel %vm68_vm7, %v46_v16, 0.0  ;;  %v215_v31 = vsel %vm68_vm7, %v128_v13, -inf  ;;  %v130_v32 = vsel %vm66_vm8, %v126_v17, 0.0 }
  0x9b   :  { %v134_v33 = vsel %vm66_vm8, %v44_v23, 0.0  ;;  %v239_v34 = vsel %vm68_vm7, %v46_v16, -inf  ;;  %v139_v35 = vmul.f32 %v130_v32, %v130_v32  ;;  %v167_v37 = vmul.f32 %v136_v29, %v132_v28 }
  0x9c   :  { %v165_v36 = vmul.f32 %v134_v33, %v130_v32  ;;  %v189_v38 = vmul.f32 %v134_v33, %v134_v33  ;;  %v213_v39 = vsel %vm66_vm8, %v126_v17, -inf  ;;  %v237_v40 = vsel %vm66_vm8, %v44_v23, -inf }
  0x9d   :  { %v141_v41 = vmul.f32 %v132_v28, %v132_v28  ;;  %v168_v42 = vsel %vm142_vm6, %v164_v26, 0.0  ;;  %v143_v44 = vsel %vm142_vm6, %v138_v24, 0.0  ;;  %v144_v45 = vsel %vm142_vm6, %v139_v35, 0.0 }
  0x9e   :  { %v169_v43 = vsel %vm142_vm6, %v165_v36, 0.0  ;;  %v171_v47 = vsel %vm142_vm6, %v166_v10, 0.0  ;;  %v173_v48 = vsel %vm142_vm6, %v167_v37, 0.0  ;;  %v145_v49 = vadd.f32 %v144_v45, %v143_v44 }
  0x9f   :  { %v170_v46 = vadd.f32 %v169_v43, %v168_v42  ;;  %v146_v50 = vsel %vm142_vm6, %v140_v18, 0.0  ;;  %v241_v51 = vsel %vm142_vm6, %v237_v40, -inf  ;;  %v242_v52 = vsel %vm142_vm6, %v238_v14, -inf }
  0xa0   :  { %v243_v53 = vsel %vm142_vm6, %v239_v34, -inf  ;;  %v147_v55 = vadd.f32 %v146_v50, %v145_v49  ;;  %v148_v56 = vsel %vm142_vm6, %v141_v41, 0.0  ;;  %v240_v57 = vsel %vm142_vm6, %v236_v27, -inf }
  0xa1   :  { %v172_v54 = vadd.f32 %v171_v47, %v170_v46  ;;  %v244_v58 = vmax.f32 %v240_v57, %v241_v51  ;;  %v191_v59 = vmul.f32 %v136_v29, %v136_v29  ;;  %v192_v60 = vsel %vm142_vm6, %v188_v30, 0.0 }
  0xa2   :  { %v193_v61 = vsel %vm142_vm6, %v189_v38, 0.0  ;;  %v149_v63 = vadd.f32 %v148_v56, %v147_v55  ;;  %v245_v0 = vmax.f32 %v242_v52, %v243_v53  ;;  %v195_v2 = vsel %vm142_vm6, %v190_v19, 0.0 }
  0xa3   :  { %v174_v62 = vadd.f32 %v173_v48, %v172_v54  ;;  %v194_v1 = vadd.f32 %v193_v61, %v192_v60  ;;  %v217_v3 = vsel %vm142_vm6, %v213_v39, -inf  ;;  %v218_v4 = vsel %vm142_vm6, %v214_v9, -inf }
  0xa4   :  { %v219_v5 = vsel %vm142_vm6, %v215_v31, -inf  ;;  %150 = vadd.xlane.f32.xlu0 %v149_v63  ;;  %v197_v7 = vsel %vm142_vm6, %v191_v59, 0.0  ;;  %v216_v8 = vsel %vm142_vm6, %v212_v25, -inf  ;;  %v246_v11 = vmax.f32 %v244_v58, %v245_v0 }
  0xa5   :  { %175 = vadd.xlane.f32.xlu1 %v174_v62  ;;  %v196_v6 = vadd.f32 %v195_v2, %v194_v1  ;;  %v220_v13 = vmax.f32 %v216_v8, %v217_v3  ;;  %v221_v14 = vmax.f32 %v218_v4, %v219_v5  ;;  %v388_v16 = vmov 0.0  }
  0xa6   :  { %34 = vst.msk [vmem:[#allocation2] sm:$0x1] %vm33_vm9, %v388_v16  ;;  %35 = vst.msk [vmem:[#allocation3] sm:$0x1] %vm33_vm9, %v388_v16  ;;  %v389_v9 = vmov -inf  }
  0xa7   :  { %v198_v12 = vadd.f32 %v197_v7, %v196_v6  ;;  %v222_v15 = vmax.f32 %v220_v13, %v221_v14  ;;  %36 = vst.msk [vmem:[#allocation4] sm:$0x1] %vm33_vm9, %v388_v16  ;;  %37 = vst.msk [vmem:[#allocation5] sm:$0x1] %vm33_vm9, %v389_v9 }
  0xa8   :  { %38 = vst.msk [vmem:[#allocation6] sm:$0x1] %vm33_vm9, %v389_v9 }
  0xa9   :  { %247 = vmax.xlane.f32.xlu1 %v246_v11  ;;  %199 = vadd.xlane.f32.xlu0 %v198_v12 }
  0xad   :  { %223 = vmax.xlane.f32.xlu0 %v222_v15  ;;  %v137_v51 = vld [vmem:[#allocation2] sm:$0x1]  ;;  %v163_v52 = vld [vmem:[#allocation3] sm:$0x1] }
  0xae   :  { %v187_v57 = vld [vmem:[#allocation4] sm:$0x1]  ;;  %v211_v60 = vld [vmem:[#allocation5] sm:$0x1] }
  0xaf   :  { %v235_v61 = vld [vmem:[#allocation6] sm:$0x1] }
 0x131   :  { %v151_v18 = vpop.xlane.xlu0 %150 }
 0x132   :  { %v176_v17 = vpop.xlane.xlu1 %175  ;;  %v152_v19 = vrot.slane %v151_v18, 4 }
 0x133   :  { %v177_v10 = vrot.slane %v176_v17, 4 }
 0x134   :  { %v153_v21 = vadd.f32 %v152_v19, %v151_v18 }
 0x135   :  { %v178_v20 = vadd.f32 %v177_v10, %v176_v17 }
 0x136   :  { %v248_v22 = vpop.xlane.xlu1 %247  ;;  %v200_v23 = vpop.xlane.xlu0 %199  ;;  %v154_v25 = vrot.slane %v153_v21, 2 }
 0x137   :  { %v179_v24 = vrot.slane %v178_v20, 2  ;;  %v249_v26 = vrot.slane %v248_v22, 4  ;;  %v201_v27 = vrot.slane %v200_v23, 4 }
 0x138   :  { %v155_v30 = vadd.f32 %v154_v25, %v153_v21 }
 0x139   :  { %v250_v28 = vmax.f32 %v248_v22, %v249_v26  ;;  %v202_v29 = vadd.f32 %v201_v27, %v200_v23  ;;  %v180_v31 = vadd.f32 %v179_v24, %v178_v20 }
 0x13a   :  { %v224_v32 = vpop.xlane.xlu0 %223  ;;  %v156_v36 = vrot.slane %v155_v30, 1 }
 0x13b   :  { %v251_v33 = vrot.slane %v250_v28, 2  ;;  %v203_v34 = vrot.slane %v202_v29, 2  ;;  %v225_v35 = vrot.slane %v224_v32, 4  ;;  %v181_v37 = vrot.slane %v180_v31, 1 }
 0x13c   :  { %v157_v39 = vadd.f32 %v156_v36, %v155_v30 }
 0x13d   :  { %v226_v38 = vmax.f32 %v224_v32, %v225_v35  ;;  %v204_v40 = vadd.f32 %v203_v34, %v202_v29  ;;  %v252_v41 = vmax.f32 %v250_v28, %v251_v33  ;;  %v182_v42 = vadd.f32 %v181_v37, %v180_v31 }
 0x13e   :  { %297 = vpush %v157_v39 }
 0x13f   :  { %v227_v43 = vrot.slane %v226_v38, 2  ;;  %v205_v44 = vrot.slane %v204_v40, 1  ;;  %299 = vpush %v182_v42  ;;  %v253_v47 = vrot.slane %v252_v41, 1 }
 0x141   :  { %v228_v45 = vmax.f32 %v226_v38, %v227_v43  ;;  %v206_v46 = vadd.f32 %v205_v44, %v204_v40  ;;  %v254_v50 = vmax.f32 %v252_v41, %v253_v47 }
 0x143   :  { %301 = vpush %v206_v46  ;;  %v229_v48 = vrot.slane %v228_v45, 1 }
 0x145   :  { %v230_v49 = vmax.f32 %v228_v45, %v229_v48 }
 0x147   :  { %303 = vpush %v230_v49 }
 0x148   :  { %305 = vpush %v254_v50 }
 0x16f   :  { %s298_s1 = spop %297 }
 0x170   :  { %v159_v53 = vstv %s298_s1  ;;  %s300_s13 = spop %299 }
 0x171   :  { %v160_v54 = vadd.f32 %v159_v53, %v137_v51  ;;  %v184_v55 = vstv %s300_s13 }
 0x172   :  { %v185_v56 = vadd.f32 %v184_v55, %v163_v52 }
 0x173   :  { %162 = vst.msk [vmem:[#allocation2] sm:$0x1] %vm33_vm9, %v160_v54 }
 0x174   :  { %s302_s14 = spop %301  ;;  %186 = vst.msk [vmem:[#allocation3] sm:$0x1] %vm33_vm9, %v185_v56 }
 0x175   :  { %v208_v58 = vstv %s302_s14 }
 0x176   :  { %v209_v59 = vadd.f32 %v208_v58, %v187_v57 }
 0x178   :  { %210 = vst.msk [vmem:[#allocation4] sm:$0x1] %vm33_vm9, %v209_v59  ;;  %s304_s15 = spop %303 }
 0x179   :  { %v232_v62 = vstv %s304_s15  ;;  %s306_s16 = spop %305 }
 0x17a   :  { %v233_v63 = vmax.f32 %v211_v60, %v232_v62  ;;  %v256_v0 = vstv %s306_s16  ;;  %v268_v6 = vld [vmem:[#allocation2] sm:$0x1] }
 0x17b   :  { %v257_v1 = vmax.f32 %v235_v61, %v256_v0  ;;  %v271_v4 = vld [vmem:[#allocation3] sm:$0x1] }
 0x17c   :  { %234 = vst.msk [vmem:[#allocation5] sm:$0x1] %vm33_vm9, %v233_v63  ;;  %v272_v12 = vmul.f32 2.0, %v271_v4 }
 0x17d   :  { %258 = vst.msk [vmem:[#allocation6] sm:$0x1] %vm33_vm9, %v257_v1 }
 0x17f   :  { %v276_v11 = vld [vmem:[#allocation4] sm:$0x1] }
 0x183   :  { %v262_v2 = vld [vmem:[#allocation5] sm:$0x1] }
 0x184   :  { %332 = vrcp.f32 %v262_v2  ;;  %v265_v3 = vld [vmem:[#allocation6] sm:$0x1] }
 0x185   :  { %334 = vrcp.f32 %v265_v3 }
 0x18e   :  { %v333_v5 = vpop.eup %332 }
 0x18f   :  { %v335_v7 = vpop.eup %334  ;;  %v269_v8 = vmul.f32 %v333_v5, %v268_v6 }
 0x190   :  { %v273_v13 = vmul.f32 %v335_v7, %v333_v5  ;;  %v277_v14 = vmul.f32 %v335_v7, %v276_v11 }
 0x191   :  { %v270_v15 = vmul.f32 %v333_v5, %v269_v8 }
 0x192   :  { %v274_v16 = vmul.f32 %v273_v13, %v272_v12  ;;  %v278_v17 = vmul.f32 %v335_v7, %v277_v14 }
 0x194   :  { %v275_v9 = vsub.f32 %v270_v15, %v274_v16 }
 0x196   :  { %v279_v18 = vadd.f32 %v278_v17, %v275_v9 }
 0x198   :  { %v280_v10 = vmul.f32 0.004166667, %v279_v18 }
 0x19a   :  { %281 = vst.msk [vmem:[#allocation10] sm:$0x1] %vm33_vm9, %v280_v10 }
 0x19b   :  { %369 = shalt.err (!%p366_p12)
}
 0x19c   :  { %s370_s23 = scalar_lea.hbm %s537_s3, 16 }
 0x19d   :  { %p371_p13 = scmp.ne.s32.totalorder %s537_s3, %s370_s23  ;;  %p374_p0 = scmp.lt.u32.totalorder %s370_s23, %s537_s3 }
 0x19f   :  { %p376_p1 = pnand %p374_p0, %p371_p13 }
 0x1a1   :  { %379 = shalt.err (!%p376_p1)
}
 0x1a2   :  { %291 = dma.vmem_to_hbm [thread:$0]  %s289_s18, 16, %s537_s3, [#allocation9]  }
 0x1a3   :  { %382 = dma.done.wait [#allocation9], 16  }
 0x1a4   :  { %383 = vsyncadd [#allocation9], 4294967280 }
 0x1a5   :  { %295 = vsyncpa [#allocation8], 1 }
 0x1a6   :  { %296 = vsyncpa [#allocation9], 1 }

</bundles_post_ra>
